<compile_context>
chip_gen: v7x
topology: tpu7x:2x2x1
jax: 0.10.0
libtpu: 0.0.40
codegen_flags: <defaults>
</compile_context>

<pallas_src>
import jax
import jax.numpy as jnp
from jax.experimental import pallas as pl
from jax.experimental.pallas import tpu as pltpu

IN_DIM = 28 * 28   # 784 — multiple of 8 sublanes, no K padding needed
H1 = 256
H2 = 128
N_OUT = 10
N_PAD = 128        # logits padded to one full lane group for lane-dense stores
MAX_TILE_B = 2048  # fits v7x's 64 MiB VMEM with headroom (see vmem_limit_bytes below)


def _round_up(x, m):
    return (x + m - 1) // m * m


def mlp_kernel(x_ref, w1_ref, b1_ref, w2_ref, b2_ref, w3_ref, b3_ref, o_ref):
    # x arrives as native f32 (no wrapper pad/cast pass over HBM); cast to bf16 on the
    # VPU right before the MXU. All matmuls accumulate in f32; bias-add + ReLU run in
    # f32; activations are cast back to bf16 before the next matmul.
    x = x_ref[...].astype(jnp.bfloat16)
    h1 = jnp.dot(x, w1_ref[...], preferred_element_type=jnp.float32) + b1_ref[...]
    h1 = jnp.maximum(h1, 0.0).astype(jnp.bfloat16)
    h2 = jnp.dot(h1, w2_ref[...], preferred_element_type=jnp.float32) + b2_ref[...]
    h2 = jnp.maximum(h2, 0.0).astype(jnp.bfloat16)
    out = jnp.dot(h2, w3_ref[...], preferred_element_type=jnp.float32) + b3_ref[...]
    o_ref[...] = out.astype(o_ref.dtype)


def _choose_batch_tile(b, cap):
    """Tiny batch: one full-array block (no masking). Otherwise aim for >= 2 grid
    steps (megacore sharding on v7x), tile rows a multiple of 16, capped by VMEM."""
    if b <= 32:
        return b
    tb = _round_up(pl.cdiv(b, 2), 16)
    return min(cap, tb)


def mnist_net_forward(x_nchw, params, *, tile_b=MAX_TILE_B):
    """Forward pass of MnistNet.

    x_nchw: (B, 1, 28, 28) float32  (PyTorch NCHW convention)
    params: dict with w1 (784,256), b1 (1,256), w2 (256,128), b2 (1,128),
            w3 (128,10), b3 (1,10)   (weights stored as (in, out) = PyTorch W.T)
    returns: (B, 10) float32 logits
    """
    b = x_nchw.shape[0]
    x = x_nchw.reshape(b, IN_DIM)            # x.view(-1, 28*28); stays f32, no pad

    tb = _choose_batch_tile(b, tile_b)
    grid = (pl.cdiv(b, tb),)

    # Weights are VMEM-resident (constant index_map) so these casts/pads are a tiny
    # fixed cost, not a per-row HBM pass.
    w1 = params["w1"].astype(jnp.bfloat16)                                   # (784, 256)
    b1 = params["b1"].astype(jnp.float32)                                    # (1, 256)
    w2 = params["w2"].astype(jnp.bfloat16)                                   # (256, 128)
    b2 = params["b2"].astype(jnp.float32)                                    # (1, 128)
    w3 = jnp.pad(params["w3"], ((0, 0), (0, N_PAD - N_OUT))).astype(jnp.bfloat16)
    b3 = jnp.pad(params["b3"], ((0, 0), (0, N_PAD - N_OUT))).astype(jnp.float32)

    flops = 2 * b * (IN_DIM * H1 + H1 * H2 + H2 * N_OUT)
    bytes_accessed = (
        b * (IN_DIM * 4 + N_PAD * 2)                 # stream x (f32) + logits (bf16)
        + (IN_DIM * H1 + H1 * H2 + H2 * N_PAD) * 2   # bf16 weights (resident)
        + (H1 + H2 + N_PAD) * 4                      # f32 biases
    )

    out = pl.pallas_call(
        mlp_kernel,
        out_shape=jax.ShapeDtypeStruct((b, N_PAD), jnp.bfloat16),
        grid_spec=pltpu.PrefetchScalarGridSpec(
            num_scalar_prefetch=0,
            grid=grid,
            in_specs=[
                pl.BlockSpec((tb, IN_DIM), lambda i: (i, 0)),   # x: batch-tiled, pipelined
                pl.BlockSpec((IN_DIM, H1), lambda i: (0, 0)),   # w1: VMEM-resident
                pl.BlockSpec((1, H1), lambda i: (0, 0)),        # b1
                pl.BlockSpec((H1, H2), lambda i: (0, 0)),       # w2
                pl.BlockSpec((1, H2), lambda i: (0, 0)),        # b2
                pl.BlockSpec((H2, N_PAD), lambda i: (0, 0)),    # w3 (col-padded to 128)
                pl.BlockSpec((1, N_PAD), lambda i: (0, 0)),     # b3 (col-padded to 128)
            ],
            out_specs=pl.BlockSpec((tb, N_PAD), lambda i: (i, 0)),
        ),
        compiler_params=pltpu.CompilerParams(
            dimension_semantics=("parallel",),
            vmem_limit_bytes=48 * 1024 * 1024,
        ),
        cost_estimate=pl.CostEstimate(
            flops=flops, transcendentals=0, bytes_accessed=bytes_accessed),
    )(x, w1, b1, w2, b2, w3, b3)

    return out[:, :N_OUT].astype(jnp.float32)


def init_params(key):
    """Deterministic synthetic parameters with the shapes MnistNet.__init__ implies."""
    ks = jax.random.split(key, 6)

    def linear(kw, kb, fan_in, fan_out):
        # Kaiming-uniform-ish bound like PyTorch's default Linear init.
        bound = 1.0 / jnp.sqrt(float(fan_in))
        w = jax.random.uniform(kw, (fan_in, fan_out), jnp.float32, -bound, bound)
        b = jax.random.uniform(kb, (1, fan_out), jnp.float32, -bound, bound)
        return w, b

    w1, b1 = linear(ks[0], ks[1], IN_DIM, H1)
    w2, b2 = linear(ks[2], ks[3], H1, H2)
    w3, b3 = linear(ks[4], ks[5], H2, N_OUT)
    return {"w1": w1, "b1": b1, "w2": w2, "b2": b2, "w3": w3, "b3": b3}


def reference_forward(x_nchw, params):
    x = x_nchw.reshape(x_nchw.shape[0], IN_DIM)
    h1 = jnp.maximum(x @ params["w1"] + params["b1"], 0.0)
    h2 = jnp.maximum(h1 @ params["w2"] + params["b2"], 0.0)
    return h2 @ params["w3"] + params["b3"]


if __name__ == "__main__":
    key = jax.random.PRNGKey(0)
    k_x, k_p = jax.random.split(key)

    # Small MNIST-like batch: (B, C, H, W) = (2, 1, 28, 28)
    x = jax.random.normal(k_x, (2, 1, 28, 28), jnp.float32)
    params = init_params(k_p)

    out = jax.jit(mnist_net_forward)(x, params)
    out = jax.block_until_ready(out)

    ref = reference_forward(x, params)
    assert out.shape == (2, 10)
    # bf16 MXU inputs + bf16 logits writeback (f32 accumulation) -> looser tolerance
    # vs the pure-f32 reference.
    assert jnp.allclose(out, ref, atol=5e-2, rtol=5e-2)

    print("KERNEL_OK")
</pallas_src>

<mosaic_0001>
module attributes {stable_mosaic.version = 11 : i64} {
  func.func @mlp_kernel(%arg0: i32, %arg1: memref<2x784xf32, #tpu.memory_space<vmem>>, %arg2: memref<784x256xbf16, #tpu.memory_space<vmem>>, %arg3: memref<1x256xf32, #tpu.memory_space<vmem>>, %arg4: memref<256x128xbf16, #tpu.memory_space<vmem>>, %arg5: memref<1x128xf32, #tpu.memory_space<vmem>>, %arg6: memref<128x128xbf16, #tpu.memory_space<vmem>>, %arg7: memref<1x128xf32, #tpu.memory_space<vmem>>, %arg8: memref<2x128xbf16, #tpu.memory_space<vmem>>) attributes {dimension_semantics = [#tpu.dimension_semantics<parallel>], iteration_bounds = array<i64: 1>, scalar_prefetch = 0 : i64, scratch_operands = 0 : i64, tpu.core_type = #tpu.core_type<tc>, window_params = [{transform_indices = @transform_0, window_bounds = array<i64: 2, 784>}, {pipeline_mode = #tpu.pipeline_mode<synchronous>, transform_indices = @transform_1, window_bounds = array<i64: 784, 256>}, {pipeline_mode = #tpu.pipeline_mode<synchronous>, transform_indices = @transform_2, window_bounds = array<i64: 1, 256>}, {pipeline_mode = #tpu.pipeline_mode<synchronous>, transform_indices = @transform_3, window_bounds = array<i64: 256, 128>}, {pipeline_mode = #tpu.pipeline_mode<synchronous>, transform_indices = @transform_4, window_bounds = array<i64: 1, 128>}, {pipeline_mode = #tpu.pipeline_mode<synchronous>, transform_indices = @transform_5, window_bounds = array<i64: 128, 128>}, {pipeline_mode = #tpu.pipeline_mode<synchronous>, transform_indices = @transform_6, window_bounds = array<i64: 1, 128>}, {transform_indices = @transform_7, window_bounds = array<i64: 2, 128>}]} {
    %c0 = arith.constant 0 : index
    %c0_0 = arith.constant 0 : index
    %0 = vector.load %arg1[%c0, %c0_0] : memref<2x784xf32, #tpu.memory_space<vmem>>, vector<2x784xf32>
    %1 = arith.truncf %0 : vector<2x784xf32> to vector<2x784xbf16>
    %c0_1 = arith.constant 0 : index
    %c0_2 = arith.constant 0 : index
    %2 = vector.load %arg2[%c0_1, %c0_2] : memref<784x256xbf16, #tpu.memory_space<vmem>>, vector<784x256xbf16>
    %cst = arith.constant dense<0.000000e+00> : vector<2x256xf32>
    %3 = tpu.matmul %1, %2, %cst {dimension_numbers = #tpu.dot_dimension_numbers<[1], [0], [0], [1], [0, 0, 1, 1], [], []>} : vector<2x784xbf16>, vector<784x256xbf16>, vector<2x256xf32> -> vector<2x256xf32>
    %c0_3 = arith.constant 0 : index
    %c0_4 = arith.constant 0 : index
    %4 = vector.load %arg3[%c0_3, %c0_4] : memref<1x256xf32, #tpu.memory_space<vmem>>, vector<1x256xf32>
    %5 = vector.broadcast %4 : vector<1x256xf32> to vector<2x256xf32>
    %6 = arith.addf %3, %5 : vector<2x256xf32>
    %cst_5 = arith.constant 0.000000e+00 : f32
    %7 = vector.broadcast %cst_5 : f32 to vector<2x256xf32>
    %8 = arith.maximumf %6, %7 : vector<2x256xf32>
    %9 = arith.truncf %8 : vector<2x256xf32> to vector<2x256xbf16>
    %c0_6 = arith.constant 0 : index
    %c0_7 = arith.constant 0 : index
    %10 = vector.load %arg4[%c0_6, %c0_7] : memref<256x128xbf16, #tpu.memory_space<vmem>>, vector<256x128xbf16>
    %cst_8 = arith.constant dense<0.000000e+00> : vector<2x128xf32>
    %11 = tpu.matmul %9, %10, %cst_8 {dimension_numbers = #tpu.dot_dimension_numbers<[1], [0], [0], [1], [0, 0, 1, 1], [], []>} : vector<2x256xbf16>, vector<256x128xbf16>, vector<2x128xf32> -> vector<2x128xf32>
    %c0_9 = arith.constant 0 : index
    %c0_10 = arith.constant 0 : index
    %12 = vector.load %arg5[%c0_9, %c0_10] : memref<1x128xf32, #tpu.memory_space<vmem>>, vector<1x128xf32>
    %13 = vector.broadcast %12 : vector<1x128xf32> to vector<2x128xf32>
    %14 = arith.addf %11, %13 : vector<2x128xf32>
    %cst_11 = arith.constant 0.000000e+00 : f32
    %15 = vector.broadcast %cst_11 : f32 to vector<2x128xf32>
    %16 = arith.maximumf %14, %15 : vector<2x128xf32>
    %17 = arith.truncf %16 : vector<2x128xf32> to vector<2x128xbf16>
    %c0_12 = arith.constant 0 : index
    %c0_13 = arith.constant 0 : index
    %18 = vector.load %arg6[%c0_12, %c0_13] : memref<128x128xbf16, #tpu.memory_space<vmem>>, vector<128x128xbf16>
    %cst_14 = arith.constant dense<0.000000e+00> : vector<2x128xf32>
    %19 = tpu.matmul %17, %18, %cst_14 {dimension_numbers = #tpu.dot_dimension_numbers<[1], [0], [0], [1], [0, 0, 1, 1], [], []>} : vector<2x128xbf16>, vector<128x128xbf16>, vector<2x128xf32> -> vector<2x128xf32>
    %c0_15 = arith.constant 0 : index
    %c0_16 = arith.constant 0 : index
    %20 = vector.load %arg7[%c0_15, %c0_16] : memref<1x128xf32, #tpu.memory_space<vmem>>, vector<1x128xf32>
    %21 = vector.broadcast %20 : vector<1x128xf32> to vector<2x128xf32>
    %22 = arith.addf %19, %21 : vector<2x128xf32>
    %23 = arith.truncf %22 : vector<2x128xf32> to vector<2x128xbf16>
    %c0_17 = arith.constant 0 : index
    %c0_18 = arith.constant 0 : index
    %24 = vector.load %arg8[%c0_17, %c0_18] : memref<2x128xbf16, #tpu.memory_space<vmem>>, vector<2x128xbf16>
    tpu.vector_store %arg8[%c0_17, %c0_18], %23 {strides = array<i32>} : memref<2x128xbf16, #tpu.memory_space<vmem>>, vector<2x128xbf16>,
    return
  }
  func.func @transform_0(%arg0: i32) -> (i32, i32) {
    %c0_i32 = arith.constant 0 : i32
    %c0_i32_0 = arith.constant 0 : i32
    return %arg0, %c0_i32 : i32, i32
  }
  func.func @transform_1(%arg0: i32) -> (i32, i32) {
    %c0_i32 = arith.constant 0 : i32
    %c0_i32_0 = arith.constant 0 : i32
    %c0_i32_1 = arith.constant 0 : i32
    return %c0_i32, %c0_i32_0 : i32, i32
  }
  func.func @transform_2(%arg0: i32) -> (i32, i32) {
    %c0_i32 = arith.constant 0 : i32
    %c0_i32_0 = arith.constant 0 : i32
    %c0_i32_1 = arith.constant 0 : i32
    return %c0_i32, %c0_i32_0 : i32, i32
  }
  func.func @transform_3(%arg0: i32) -> (i32, i32) {
    %c0_i32 = arith.constant 0 : i32
    %c0_i32_0 = arith.constant 0 : i32
    %c0_i32_1 = arith.constant 0 : i32
    return %c0_i32, %c0_i32_0 : i32, i32
  }
  func.func @transform_4(%arg0: i32) -> (i32, i32) {
    %c0_i32 = arith.constant 0 : i32
    %c0_i32_0 = arith.constant 0 : i32
    %c0_i32_1 = arith.constant 0 : i32
    return %c0_i32, %c0_i32_0 : i32, i32
  }
  func.func @transform_5(%arg0: i32) -> (i32, i32) {
    %c0_i32 = arith.constant 0 : i32
    %c0_i32_0 = arith.constant 0 : i32
    %c0_i32_1 = arith.constant 0 : i32
    return %c0_i32, %c0_i32_0 : i32, i32
  }
  func.func @transform_6(%arg0: i32) -> (i32, i32) {
    %c0_i32 = arith.constant 0 : i32
    %c0_i32_0 = arith.constant 0 : i32
    %c0_i32_1 = arith.constant 0 : i32
    return %c0_i32, %c0_i32_0 : i32, i32
  }
  func.func @transform_7(%arg0: i32) -> (i32, i32) {
    %c0_i32 = arith.constant 0 : i32
    %c0_i32_0 = arith.constant 0 : i32
    return %arg0, %c0_i32 : i32, i32
  }
}

</mosaic_0001>

<bundles_post_ra>
// kernel: mnist_net_forward.1
= control target key start
LH: loop header
LB: loop body
LE: loop exit
PB: predicated region body
PF: predicated region fallthrough
CT: control target
= control target key end

     0   :  { %v1509_v9 = vmov 1983009808   ;;  %v35_v11 = vlaneseq  ;;  %vm678_vm0 = vcmask 130048   ;;  %vm1512_vm1 = vmmov 0   ;;  %s1970_s1 = inlined_call_operand.vmem [shape: bf16[784,256], index: 1, kind: input, shape index: {}]   ;;  %s1971_s0 = inlined_call_operand.vmem [shape: f32[2,784], index: 0, kind: input, shape index: {}]   ;;  %s1972_s3 = inlined_call_operand.vmem [shape: bf16[256,128], index: 3, kind: input, shape index: {}]   ;;  %s1973_s5 = inlined_call_operand.vmem [shape: bf16[128,128], index: 5, kind: input, shape index: {}]   ;;  %s1974_s2 = inlined_call_operand.vmem [shape: f32[1,256], index: 2, kind: input, shape index: {}]   ;;  %s1975_s4 = inlined_call_operand.vmem [shape: f32[1,128], index: 4, kind: input, shape index: {}]   ;;  %s1976_s6 = inlined_call_operand.vmem [shape: f32[1,128], index: 6, kind: input, shape index: {}]   ;;  %s1977_s7 = inlined_call_operand.vmem [shape: bf16[2,128], index: 7, kind: output, shape index: {}]  }
   0x1   :  { %v1336_v0 = vld [vmem:[%s1970_s1 + $0x104] ss:$8 sps:$4 sm:$0xff]   ;;  %v1338_v1 = vld [vmem:[%s1970_s1 + $0x100] ss:$8 sps:$4 sm:$0xff]   ;;  %v1339_v2 = vld [vmem:[%s1970_s1 + $0x114] ss:$8 sps:$4 sm:$0xff]   ;;  %v33_v10 = vunpack.c.l.s4 %v1509_v9 }
   0x2   :  { %723 = vmatprep.subr.bf16.mxu0 %v1336_v0  ;;  %v1341_v3 = vld [vmem:[%s1970_s1 + $0x110] ss:$8 sps:$4 sm:$0xff]   ;;  %v1342_v4 = vld [vmem:[%s1970_s1 + $0x124] ss:$8 sps:$4 sm:$0xff]   ;;  %v1344_v5 = vld [vmem:[%s1970_s1 + $0x120] ss:$8 sps:$4 sm:$0xff]  }
   0x3   :  { %724 = vmatpush1.bf16.msra.mxu0 %v1338_v1  ;;  %v1345_v6 = vld [vmem:[%s1970_s1 + $0x134] ss:$8 sps:$4 sm:$0xff]   ;;  %v1347_v7 = vld [vmem:[%s1970_s1 + $0x130] ss:$8 sps:$4 sm:$0xff]   ;;  %v1348_v8 = vld [vmem:[%s1970_s1 + $0x144] ss:$8 sps:$4 sm:$0xff]   ;;  %v34_v14 = vunpack.c.0.s8 %v33_v10 }
   0x4   :  { %725 = vmatprep.subr.bf16.mxu0 %v1339_v2  ;;  %v1350_v12 = vld [vmem:[%s1970_s1 + $0x140] ss:$8 sps:$4 sm:$0xff]   ;;  %v1351_v13 = vld [vmem:[%s1970_s1 + $0x154] ss:$8 sps:$4 sm:$0xff]   ;;  %v1586_v15 = vshrl.u32 %v35_v11, 7 }
   0x5   :  { %v1353_v16 = vld [vmem:[%s1970_s1 + $0x150] ss:$8 sps:$4 sm:$0xff]   ;;  %v1354_v17 = vld [vmem:[%s1970_s1 + $0x164] ss:$8 sps:$4 sm:$0xff]   ;;  %v1356_v22 = vld [vmem:[%s1970_s1 + $0x160] ss:$8 sps:$4 sm:$0xff]  }
   0x6   :  { %v1595_v18 = vsub.s32 %v34_v14, %v1586_v15  ;;  %v27_v19 = vld [vmem:[%s1971_s0] sm:$0xff]  ;;  %v1357_v23 = vld [vmem:[%s1970_s1 + $0x174] ss:$8 sps:$4 sm:$0xff]   ;;  %v1359_v27 = vld [vmem:[%s1970_s1 + $0x170] ss:$8 sps:$4 sm:$0xff]  }
   0x7   :  { %726 = vmatpush1.bf16.msra.mxu0 %v1341_v3  ;;  %v31_v20 = vcombine.high %v27_v19, %v27_v19  ;;  %v1391_v26 = vld [vmem:[%s1970_s1 + $0x4] ss:$8 sps:$4 sm:$0xff]   ;;  %v1396_v29 = vld [vmem:[%s1970_s1] ss:$8 sps:$4 sm:$0xff]   ;;  %v1397_v31 = vld [vmem:[%s1970_s1 + $0x14] ss:$8 sps:$4 sm:$0xff]  }
   0x8   :  { %727 = vmatprep.subr.bf16.mxu0 %v1342_v4  ;;  %v1601_v21 = vrot.slane %v27_v19, %v1595_v18  ;;  %682 = vmatprep.subr.bf16.mxu1 %v1391_v26  ;;  %v1360_v32 = vld [vmem:[%s1970_s1 + $0x184] ss:$8 sps:$4 sm:$0xff]   ;;  %v1402_v34 = vld [vmem:[%s1970_s1 + $0x10] ss:$8 sps:$4 sm:$0xff]   ;;  %v1362_v36 = vld [vmem:[%s1970_s1 + $0x180] ss:$8 sps:$4 sm:$0xff]  }
   0x9   :  { %v1610_v24 = vrot.slane %v31_v20, %v1595_v18  ;;  %683 = vmatpush1.bf16.msra.mxu1 %v1396_v29  ;;  %v1403_v35 = vld [vmem:[%s1970_s1 + $0x24] ss:$8 sps:$4 sm:$0xff]   ;;  %v1363_v37 = vld [vmem:[%s1970_s1 + $0x194] ss:$8 sps:$4 sm:$0xff]   ;;  %v1408_v38 = vld [vmem:[%s1970_s1 + $0x20] ss:$8 sps:$4 sm:$0xff]  }
   0xa   :  { %v46_v25 = vcombine.high %v1601_v21, %v1601_v21  ;;  %684 = vmatprep.subr.bf16.mxu1 %v1397_v31  ;;  %v1409_v39 = vld [vmem:[%s1970_s1 + $0x34] ss:$8 sps:$4 sm:$0xff]   ;;  %v1365_v40 = vld [vmem:[%s1970_s1 + $0x190] ss:$8 sps:$4 sm:$0xff]   ;;  %v1366_v41 = vld [vmem:[%s1970_s1 + $0x1a4] ss:$8 sps:$4 sm:$0xff]  }
   0xb   :  { %728 = vmatpush1.bf16.msra.mxu0 %v1344_v5  ;;  %v47_v28 = vcombine.high %v1610_v24, %v1610_v24  ;;  %v1414_v42 = vld [vmem:[%s1970_s1 + $0x30] ss:$8 sps:$4 sm:$0xff]   ;;  %v1415_v43 = vld [vmem:[%s1970_s1 + $0x44] ss:$8 sps:$4 sm:$0xff]   ;;  %v1368_v44 = vld [vmem:[%s1970_s1 + $0x1a0] ss:$8 sps:$4 sm:$0xff]   ;;  %v73_v5 = vpack.c.bf16 %v1610_v24, %v1610_v24 }
   0xc   :  { %729 = vmatprep.subr.bf16.mxu0 %v1345_v6  ;;  %v72_v30 = vpack.c.bf16 %v46_v25, %v46_v25  ;;  %v1369_v45 = vld [vmem:[%s1970_s1 + $0x1b4] ss:$8 sps:$4 sm:$0xff]   ;;  %v1420_v46 = vld [vmem:[%s1970_s1 + $0x40] ss:$8 sps:$4 sm:$0xff]   ;;  %v1371_v48 = vld [vmem:[%s1970_s1 + $0x1b0] ss:$8 sps:$4 sm:$0xff]  }
   0xd   :  { %v74_v33 = vpack.c.bf16 %v47_v28, %v47_v28  ;;  %685 = vmatpush1.bf16.msra.mxu1 %v1402_v34  ;;  %v1421_v47 = vld [vmem:[%s1970_s1 + $0x54] ss:$8 sps:$4 sm:$0xff]   ;;  %v1372_v49 = vld [vmem:[%s1970_s1 + $0x1c4] ss:$8 sps:$4 sm:$0xff]   ;;  %v1426_v50 = vld [vmem:[%s1970_s1 + $0x50] ss:$8 sps:$4 sm:$0xff]  }
   0xe   :  { %714 = vmatprep.mubr.bf16.mxu1 %v72_v30  ;;  %686 = vmatprep.subr.bf16.mxu1 %v1403_v35  ;;  %v1427_v51 = vld [vmem:[%s1970_s1 + $0x64] ss:$8 sps:$4 sm:$0xff]   ;;  %v1374_v52 = vld [vmem:[%s1970_s1 + $0x1c0] ss:$8 sps:$4 sm:$0xff]   ;;  %v1375_v53 = vld [vmem:[%s1970_s1 + $0x1d4] ss:$8 sps:$4 sm:$0xff]  }
   0xf   :  { %730 = vmatpush1.bf16.msra.mxu0 %v1347_v7  ;;  %755 = vmatprep.mubr.bf16.mxu0 %v74_v33  ;;  %v1432_v54 = vld [vmem:[%s1970_s1 + $0x60] ss:$8 sps:$4 sm:$0xff]   ;;  %v1433_v55 = vld [vmem:[%s1970_s1 + $0x74] ss:$8 sps:$4 sm:$0xff]   ;;  %v1377_v56 = vld [vmem:[%s1970_s1 + $0x1d0] ss:$8 sps:$4 sm:$0xff]  }
  0x10   :  { %731 = vmatprep.subr.bf16.mxu0 %v1348_v8  ;;  %v1378_v57 = vld [vmem:[%s1970_s1 + $0x1e4] ss:$8 sps:$4 sm:$0xff]   ;;  %v1438_v58 = vld [vmem:[%s1970_s1 + $0x70] ss:$8 sps:$4 sm:$0xff]   ;;  %v1380_v60 = vld [vmem:[%s1970_s1 + $0x1e0] ss:$8 sps:$4 sm:$0xff]  }
  0x11   :  { %687 = vmatpush1.bf16.msra.mxu1 %v1408_v38  ;;  %v1439_v59 = vld [vmem:[%s1970_s1 + $0x84] ss:$8 sps:$4 sm:$0xff]   ;;  %v1381_v61 = vld [vmem:[%s1970_s1 + $0x1f4] ss:$8 sps:$4 sm:$0xff]   ;;  %v1444_v62 = vld [vmem:[%s1970_s1 + $0x80] ss:$8 sps:$4 sm:$0xff]   ;;  %v71_v38 = vpack.c.bf16 %v1601_v21, %v1601_v21 }
  0x12   :  { %688 = vmatprep.subr.bf16.mxu1 %v1409_v39  ;;  %v1445_v63 = vld [vmem:[%s1970_s1 + $0x94] ss:$8 sps:$4 sm:$0xff]   ;;  %v1383_v0 = vld [vmem:[%s1970_s1 + $0x1f0] ss:$8 sps:$4 sm:$0xff]   ;;  %v1387_v1 = vld [vmem:[%s1970_s1 + $0x204] ss:$8 sps:$4 sm:$0xff]  }
  0x13   :  { %732 = vmatpush1.bf16.msra.mxu0 %v1350_v12  ;;  %v1450_v2 = vld [vmem:[%s1970_s1 + $0x90] ss:$8 sps:$4 sm:$0xff]   ;;  %v1451_v3 = vld [vmem:[%s1970_s1 + $0xa4] ss:$8 sps:$4 sm:$0xff]   ;;  %v1385_v8 = vld [vmem:[%s1970_s1 + $0x200] ss:$8 sps:$4 sm:$0xff]  }
  0x14   :  { %733 = vmatprep.subr.bf16.mxu0 %v1351_v13  ;;  %v28_v4 = vld [vmem:[%s1971_s0 + $0x8] sm:$0x3f]  ;;  %v1390_v9 = vld [vmem:[%s1970_s1 + $0x214] ss:$8 sps:$4 sm:$0xff]   ;;  %v1388_v14 = vld [vmem:[%s1970_s1 + $0x210] ss:$8 sps:$4 sm:$0xff]  }
  0x15   :  { %689 = vmatpush1.bf16.msra.mxu1 %v1414_v42  ;;  %v48_v6 = vcombine.high %v28_v4, %v28_v4  ;;  %v1739_v7 = vrot.slane %v28_v4, %v1595_v18  ;;  %v1456_v10 = vld [vmem:[%s1970_s1 + $0xa0] ss:$8 sps:$4 sm:$0xff]   ;;  %v1457_v13 = vld [vmem:[%s1970_s1 + $0xb4] ss:$8 sps:$4 sm:$0xff]   ;;  %v1463_v19 = vld [vmem:[%s1970_s1 + $0xc4] ss:$8 sps:$4 sm:$0xff]  }
  0x16   :  { %690 = vmatprep.subr.bf16.mxu1 %v1415_v43  ;;  %v1393_v20 = vld [vmem:[%s1970_s1 + $0x220] ss:$8 sps:$4 sm:$0xff]   ;;  %v1399_v24 = vld [vmem:[%s1970_s1 + $0x230] ss:$8 sps:$4 sm:$0xff]   ;;  %v1469_v25 = vld [vmem:[%s1970_s1 + $0xd4] ss:$8 sps:$4 sm:$0xff]  }
  0x17   :  { %734 = vmatpush1.bf16.msra.mxu0 %v1353_v16  ;;  %v1751_v11 = vrot.slane %v48_v6, %v1595_v18  ;;  %v63_v12 = vcombine.high %v1739_v7, %v1739_v7  ;;  %v1462_v18 = vld [vmem:[%s1970_s1 + $0xb0] ss:$8 sps:$4 sm:$0xff]   ;;  %v1407_v26 = vld [vmem:[%s1970_s1 + $0x244] ss:$8 sps:$4 sm:$0xff]   ;;  %v1405_v29 = vld [vmem:[%s1970_s1 + $0x240] ss:$8 sps:$4 sm:$0xff]  }
  0x18   :  { %735 = vmatprep.subr.bf16.mxu0 %v1354_v17  ;;  %v1395_v17 = vld [vmem:[%s1970_s1 + $0x224] ss:$8 sps:$4 sm:$0xff]   ;;  %v1413_v30 = vld [vmem:[%s1970_s1 + $0x254] ss:$8 sps:$4 sm:$0xff]   ;;  %v1481_v31 = vld [vmem:[%s1970_s1 + $0xe0] ss:$8 sps:$4 sm:$0xff]  }
  0x19   :  { %691 = vmatpush1.bf16.msra.mxu1 %v1420_v46  ;;  %v76_v16 = vpack.c.bf16 %v63_v12, %v63_v12  ;;  %v1476_v28 = vld [vmem:[%s1970_s1 + $0xe4] ss:$8 sps:$4 sm:$0xff]   ;;  %v1411_v33 = vld [vmem:[%s1970_s1 + $0x250] ss:$8 sps:$4 sm:$0xff]   ;;  %v1425_v39 = vld [vmem:[%s1970_s1 + $0x274] ss:$8 sps:$4 sm:$0xff]  }
  0x1a   :  { %692 = vmatprep.subr.bf16.mxu1 %v1421_v47  ;;  %v1419_v34 = vld [vmem:[%s1970_s1 + $0x264] ss:$8 sps:$4 sm:$0xff]   ;;  %v1484_v35 = vld [vmem:[%s1970_s1 + $0xf0] ss:$8 sps:$4 sm:$0xff]   ;;  %v1437_v46 = vld [vmem:[%s1970_s1 + $0x294] ss:$8 sps:$4 sm:$0xff]  }
  0x1b   :  { %736 = vmatpush1.bf16.msra.mxu0 %v1356_v22  ;;  %v1401_v22 = vld [vmem:[%s1970_s1 + $0x234] ss:$8 sps:$4 sm:$0xff]   ;;  %v1423_v21 = vld [vmem:[%s1970_s1 + $0x270] ss:$8 sps:$4 sm:$0xff]   ;;  %v1431_v42 = vld [vmem:[%s1970_s1 + $0x284] ss:$8 sps:$4 sm:$0xff]  }
  0x1c   :  { %737 = vmatprep.subr.bf16.mxu0 %v1357_v23  ;;  %v1468_v23 = vld [vmem:[%s1970_s1 + $0xc0] ss:$8 sps:$4 sm:$0xff]   ;;  %v1490_v47 = vld [vmem:[%s1972_s3 + $0x10] sm:$0xff]   ;;  %v1510_v4 = vmov 0   ;;  %v1511_v12 = vmov 0.0  }
  0x1d   :  { %693 = vmatpush1.bf16.msra.mxu1 %v1426_v50  ;;  %v1488_v43 = vld [vmem:[%s1972_s3 + $0x8] sm:$0xff]  }
  0x1e   :  { %694 = vmatprep.subr.bf16.mxu1 %v1427_v51  ;;  %v1443_v50 = vld [vmem:[%s1970_s1 + $0x2a4] ss:$8 sps:$4 sm:$0xff]   ;;  %v1492_v51 = vld [vmem:[%s1972_s3 + $0x18] sm:$0xff]  }
  0x1f   :  { %738 = vmatpush1.bf16.msra.mxu0 %v1359_v27  ;;  %v1474_v27 = vld [vmem:[%s1970_s1 + $0xd0] ss:$8 sps:$4 sm:$0xff]   ;;  %v1495_v6 = vld [vmem:[%s1972_s3 + $0x68] sm:$0xff]  }
  0x20   :  { %739 = vmatprep.subr.bf16.mxu0 %v1360_v32  ;;  %v1482_v32 = vld [vmem:[%s1970_s1 + $0xf4] ss:$8 sps:$4 sm:$0xff]  }
  0x21   :  { %695 = vmatpush1.bf16.msra.mxu1 %v1432_v54  ;;  %v1449_v54 = vld [vmem:[%s1970_s1 + $0x2b4] ss:$8 sps:$4 sm:$0xff]  }
  0x22   :  { %696 = vmatprep.subr.bf16.mxu1 %v1433_v55  ;;  %v1494_v55 = vld [vmem:[%s1972_s3 + $0x20] sm:$0xff]  }
  0x23   :  { %740 = vmatpush1.bf16.msra.mxu0 %v1362_v36  ;;  %v1485_v36 = vld [vmem:[%s1972_s3 + $0x40] sm:$0xff]  }
  0x24   :  { %741 = vmatprep.subr.bf16.mxu0 %v1363_v37  ;;  %v1417_v37 = vld [vmem:[%s1970_s1 + $0x260] ss:$8 sps:$4 sm:$0xff]  }
  0x25   :  { %697 = vmatpush1.bf16.msra.mxu1 %v1438_v58  ;;  %v1453_v58 = vld [vmem:[%s1970_s1 + $0x2c0] ss:$8 sps:$4 sm:$0xff]  }
  0x26   :  { %698 = vmatprep.subr.bf16.mxu1 %v1439_v59  ;;  %v1461_v59 = vld [vmem:[%s1970_s1 + $0x2d4] ss:$8 sps:$4 sm:$0xff]  }
  0x27   :  { %742 = vmatpush1.bf16.msra.mxu0 %v1365_v40  ;;  %v1486_v40 = vld [vmem:[%s1972_s3] sm:$0xff]  }
  0x28   :  { %743 = vmatprep.subr.bf16.mxu0 %v1366_v41  ;;  %v1487_v41 = vld [vmem:[%s1972_s3 + $0x48] sm:$0xff]  }
  0x29   :  { %699 = vmatpush1.bf16.msra.mxu1 %v1444_v62  ;;  %v1465_v62 = vld [vmem:[%s1970_s1 + $0x2e0] ss:$8 sps:$4 sm:$0xff]  }
  0x2a   :  { %700 = vmatprep.subr.bf16.mxu1 %v1445_v63  ;;  %v1473_v63 = vld [vmem:[%s1970_s1 + $0x2f4] ss:$8 sps:$4 sm:$0xff]  }
  0x2b   :  { %744 = vmatpush1.bf16.msra.mxu0 %v1368_v44  ;;  %v1489_v44 = vld [vmem:[%s1972_s3 + $0x50] sm:$0xff]  }
  0x2c   :  { %745 = vmatprep.subr.bf16.mxu0 %v1369_v45  ;;  %v1429_v45 = vld [vmem:[%s1970_s1 + $0x280] ss:$8 sps:$4 sm:$0xff]  }
  0x2d   :  { %701 = vmatpush1.bf16.msra.mxu1 %v1450_v2  ;;  %v75_v2 = vpack.c.bf16 %v1739_v7, %v1739_v7  ;;  %v1496_v7 = vld [vmem:[%s1972_s3 + $0x28] sm:$0xff]  }
  0x2e   :  { %702 = vmatprep.subr.bf16.mxu1 %v1451_v3  ;;  %v1478_v3 = vld [vmem:[%s1970_s1 + $0x300] ss:$8 sps:$4 sm:$0xff]  }
  0x2f   :  { %746 = vmatpush1.bf16.msra.mxu0 %v1371_v48  ;;  %v1491_v48 = vld [vmem:[%s1972_s3 + $0x58] sm:$0xff]  }
  0x30   :  { %747 = vmatprep.subr.bf16.mxu0 %v1372_v49  ;;  %v1435_v49 = vld [vmem:[%s1970_s1 + $0x290] ss:$8 sps:$4 sm:$0xff]  }
  0x31   :  { %703 = vmatpush1.bf16.msra.mxu1 %v1456_v10  ;;  %v1499_v10 = vld [vmem:[%s1972_s3 + $0x78] sm:$0xff]  }
  0x32   :  { %704 = vmatprep.subr.bf16.mxu1 %v1457_v13 }
  0x33   :  { %748 = vmatpush1.bf16.msra.mxu0 %v1374_v52  ;;  %v1493_v52 = vld [vmem:[%s1972_s3 + $0x60] sm:$0xff]  }
  0x34   :  { %749 = vmatprep.subr.bf16.mxu0 %v1375_v53  ;;  %v1441_v53 = vld [vmem:[%s1970_s1 + $0x2a0] ss:$8 sps:$4 sm:$0xff]  }
  0x35   :  { %705 = vmatpush1.bf16.msra.mxu1 %v1462_v18  ;;  %v180_v18 = vsub.s32 0, %v1586_v15 }
  0x36   :  { %706 = vmatprep.subr.bf16.mxu1 %v1463_v19  ;;  %v176_v19 = vld [vmem:[%s1974_s2] sm:$0x3] }
  0x37   :  { %750 = vmatpush1.bf16.msra.mxu0 %v1377_v56  ;;  %v1447_v56 = vld [vmem:[%s1970_s1 + $0x2b0] ss:$8 sps:$4 sm:$0xff]  }
  0x38   :  { %751 = vmatprep.subr.bf16.mxu0 %v1378_v57  ;;  %v1455_v57 = vld [vmem:[%s1970_s1 + $0x2c4] ss:$8 sps:$4 sm:$0xff]  }
  0x39   :  { %707 = vmatpush1.bf16.msra.mxu1 %v1468_v23 }
  0x3a   :  { %708 = vmatprep.subr.bf16.mxu1 %v1469_v25 }
  0x3b   :  { %752 = vmatpush1.bf16.msra.mxu0 %v1380_v60  ;;  %v1459_v60 = vld [vmem:[%s1970_s1 + $0x2d0] ss:$8 sps:$4 sm:$0xff]  }
  0x3c   :  { %753 = vmatprep.subr.bf16.mxu0 %v1381_v61  ;;  %v1467_v61 = vld [vmem:[%s1970_s1 + $0x2e4] ss:$8 sps:$4 sm:$0xff]  }
  0x3d   :  { %709 = vmatpush1.bf16.msra.mxu1 %v1474_v27 }
  0x3e   :  { %710 = vmatprep.subr.bf16.mxu1 %v1476_v28 }
  0x3f   :  { %754 = vmatpush1.bf16.msra.mxu0 %v1383_v0  ;;  %v1471_v0 = vld [vmem:[%s1970_s1 + $0x2f0] ss:$8 sps:$4 sm:$0xff]  }
  0x40   :  { %764 = vmatprep.subr.bf16.mxu0 %v1387_v1  ;;  %v1480_v1 = vld [vmem:[%s1970_s1 + $0x304] ss:$8 sps:$4 sm:$0xff]  }
  0x41   :  { %711 = vmatpush1.bf16.msra.mxu1 %v1481_v31 }
  0x42   :  { %756 = vmatmul.mubr.bf16.vlgmr.msra.gmra.mrb[0].mxu0 %v73_v5  ;;  %712 = vmatprep.subr.bf16.mxu1 %v1482_v32  ;;  %v77_v5 = vpack.c.bf16 %v1751_v11, %v1751_v11  ;;  %v1500_v11 = vld [vmem:[%s1972_s3 + $0x38] sm:$0xff]  }
  0x43   :  { %765 = vmatpush1.bf16.msra.mxu0 %v1385_v8  ;;  %796 = vmatprep.mubr.bf16.mxu0 %v76_v16  ;;  %v1497_v8 = vld [vmem:[%s1972_s3 + $0x70] sm:$0xff]  }
  0x44   :  { %766 = vmatprep.subr.bf16.mxu0 %v1390_v9  ;;  %v1498_v9 = vld [vmem:[%s1972_s3 + $0x30] sm:$0xff]  }
  0x45   :  { %713 = vmatpush1.bf16.msra.mxu1 %v1484_v35  ;;  %v1501_v35 = vld [vmem:[%s1973_s5] sm:$0xff]  }
  0x46   :  { %1269 = vmatprep.subr.bf16.mxu1 %v1485_v36 }
  0x47   :  { %767 = vmatpush1.bf16.msra.mxu0 %v1388_v14 }
  0x48   :  { %768 = vmatprep.subr.bf16.mxu0 %v1395_v17  ;;  %715 = vmatmul.mubr.bf16.vlgmr.msra.gmra.mrb[0].mxu1 %v71_v38  ;;  %v1504_v38 = vld [vmem:[%s1973_s5 + $0x18] sm:$0xff]  }
  0x49   :  { %1270 = vmatpush3.bf16.msra.mxu1 %v1486_v40  ;;  %v1506_v40 = vld [vmem:[%s1973_s5 + $0x28] sm:$0xff]  }
  0x4a   :  { %1271 = vmatprep.subr.bf16.mxu1 %v1487_v41  ;;  %v1507_v41 = vld [vmem:[%s1973_s5 + $0x30] sm:$0xff]  }
  0x4b   :  { %769 = vmatpush1.bf16.msra.mxu0 %v1393_v20  ;;  %v184_v20 = vsub.s32 1, %v1586_v15  ;;  %v1502_v15 = vld [vmem:[%s1973_s5 + $0x8] sm:$0xff]  }
  0x4c   :  { %770 = vmatprep.subr.bf16.mxu0 %v1401_v22  ;;  %v181_v22 = vrot.slane %v176_v19, %v180_v18 }
  0x4d   :  { %1272 = vmatpush3.bf16.msra.mxu1 %v1488_v43  ;;  %v185_v23 = vrot.slane %v176_v19, %v184_v20  ;;  %v1243_v43 = vld [vmem:[%s1975_s4] ss:$0 sm:$0xff] }
  0x4e   :  { %1273 = vmatprep.subr.bf16.mxu1 %v1489_v44 }
  0x4f   :  { %771 = vmatpush1.bf16.msra.mxu0 %v1399_v24 }
  0x50   :  { %772 = vmatprep.subr.bf16.mxu0 %v1407_v26 }
  0x51   :  { %1274 = vmatpush3.bf16.msra.mxu1 %v1490_v47 }
  0x52   :  { %1275 = vmatprep.subr.bf16.mxu1 %v1491_v48 }
  0x53   :  { %773 = vmatpush1.bf16.msra.mxu0 %v1405_v29 }
  0x54   :  { %774 = vmatprep.subr.bf16.mxu0 %v1413_v30 }
  0x55   :  { %1276 = vmatpush3.bf16.msra.mxu1 %v1492_v51  ;;  %v1260_v51 = vld [vmem:[%s1976_s6] ss:$0 sm:$0xff] }
  0x56   :  { %1277 = vmatprep.subr.bf16.mxu1 %v1493_v52 }
  0x57   :  { %775 = vmatpush1.bf16.msra.mxu0 %v1411_v33 }
  0x58   :  { %776 = vmatprep.subr.bf16.mxu0 %v1419_v34 }
  0x59   :  { %1278 = vmatpush3.bf16.msra.mxu1 %v1494_v55 }
  0x5a   :  { %1279 = vmatprep.subr.bf16.mxu1 %v1495_v6 }
  0x5b   :  { %777 = vmatpush1.bf16.msra.mxu0 %v1417_v37  ;;  %v1503_v37 = vld [vmem:[%s1973_s5 + $0x10] sm:$0xff]  }
  0x5c   :  { %778 = vmatprep.subr.bf16.mxu0 %v1425_v39  ;;  %v1505_v39 = vld [vmem:[%s1973_s5 + $0x20] sm:$0xff]  }
  0x5d   :  { %1280 = vmatpush3.bf16.msra.mxu1 %v1496_v7 }
  0x5e   :  { %1281 = vmatprep.subr.bf16.mxu1 %v1497_v8 }
  0x5f   :  { %779 = vmatpush1.bf16.msra.mxu0 %v1423_v21  ;;  %v1508_v21 = vld [vmem:[%s1973_s5 + $0x38] sm:$0xff]  }
  0x60   :  { %780 = vmatprep.subr.bf16.mxu0 %v1431_v42 }
  0x61   :  { %1282 = vmatpush3.bf16.msra.mxu1 %v1498_v9 }
  0x62   :  { %1283 = vmatprep.subr.bf16.mxu1 %v1499_v10 }
  0x63   :  { %781 = vmatpush1.bf16.msra.mxu0 %v1429_v45 }
  0x64   :  { %782 = vmatprep.subr.bf16.mxu0 %v1437_v46 }
  0x65   :  { %1284 = vmatpush3.bf16.msra.mxu1 %v1500_v11 }
  0x66   :  { %1300 = vmatprep.subr.bf16.mxu1 %v1511_v12 }
  0x67   :  { %783 = vmatpush1.bf16.msra.mxu0 %v1435_v49 }
  0x68   :  { %784 = vmatprep.subr.bf16.mxu0 %v1443_v50 }
  0x6b   :  { %785 = vmatpush1.bf16.msra.mxu0 %v1441_v53 }
  0x6c   :  { %786 = vmatprep.subr.bf16.mxu0 %v1449_v54 }
  0x6f   :  { %787 = vmatpush1.bf16.msra.mxu0 %v1447_v56 }
  0x70   :  { %788 = vmatprep.subr.bf16.mxu0 %v1455_v57 }
  0x73   :  { %789 = vmatpush1.bf16.msra.mxu0 %v1453_v58 }
  0x74   :  { %790 = vmatprep.subr.bf16.mxu0 %v1461_v59 }
  0x77   :  { %791 = vmatpush1.bf16.msra.mxu0 %v1459_v60 }
  0x78   :  { %792 = vmatprep.subr.bf16.mxu0 %v1467_v61 }
  0x7b   :  { %793 = vmatpush1.bf16.msra.mxu0 %v1465_v62 }
  0x7c   :  { %794 = vmatprep.subr.bf16.mxu0 %v1473_v63 }
  0x7f   :  { %795 = vmatpush1.bf16.msra.mxu0 %v1471_v0 }
  0x80   :  { %805 = vmatprep.subr.bf16.mxu0 %v1480_v1 }
  0x82   :  { %797 = vmatmul.mubr.bf16.vlgmr.msra.gmra.mrb[0].mxu0 %v75_v2 }
  0x83   :  { %806 = vmatpush1.bf16.msra.mxu0 %v1478_v3  ;;  %837 = vmatprep.mubr.bf16.mxu0 %v1510_v4 }
  0x8e   :  { %1242 = vmatmul.mubr.msk.bf16.vlgmr.msra.gmra.mrb[0].mxu0 %vm678_vm0, %v77_v5 }
 0x11b   :  { %v716_v13 = vpop.f32.mrb[0].mxu1 }
 0x11c   :  { %v718_v14 = vpop.f32.mrb[1].mxu1  ;;  %v717_v24 = vadd.f32 %v716_v13, %v181_v22 }
 0x11d   :  { %v720_v16 = vpop.f32.mrb[2].mxu1  ;;  %v719_v25 = vadd.f32 %v718_v14, %v185_v23 }
 0x11e   :  { %v721_v17 = vpop.f32.mrb[3].mxu1 }
 0x161   :  { %v839_v26 = vpop.f32.mrb[0].mxu0 }
 0x162   :  { %v1321_v27 = vadd.f32 %v839_v26, %v717_v24  ;;  %v841_v28 = vpop.f32.mrb[1].mxu0 }
 0x163   :  { %v1323_v29 = vadd.f32 %v841_v28, %v719_v25  ;;  %v843_v30 = vpop.f32.mrb[2].mxu0 }
 0x164   :  { %v846_v31 = vmax.f32 %v1321_v27, 0.0  ;;  %v844_v32 = vpop.f32.mrb[3].mxu0 }
 0x165   :  { %v847_v33 = vmax.f32 %v1323_v29, 0.0 }
 0x166   :  { %v848_v36 = vpack.c.bf16 %v846_v31, %v846_v31 }
 0x167   :  { %v849_v34 = vpack.c.bf16 %v847_v33, %v847_v33 }
 0x169   :  { %1017 = vmatprep.mubr.bf16.mxu1 %v849_v34 }
 0x16a   :  { %1018 = vmatmul.mubr.bf16.vlgmr.msra.gmra.mrb[4].mxu1 %v848_v36 }
 0x16b   :  { %1301 = vmatpush3.bf16.msra.mxu1 %v1501_v35  ;;  %1316 = vmatprep.mubr.msk.bf16.mxu1 %vm1512_vm1, %v1511_v12 }
 0x16c   :  { %1302 = vmatprep.subr.bf16.mxu1 %v1511_v12 }
 0x16f   :  { %1303 = vmatpush3.bf16.msra.mxu1 %v1502_v15 }
 0x170   :  { %1304 = vmatprep.subr.bf16.mxu1 %v1511_v12 }
 0x173   :  { %1305 = vmatpush3.bf16.msra.mxu1 %v1503_v37 }
 0x174   :  { %1306 = vmatprep.subr.bf16.mxu1 %v1511_v12 }
 0x177   :  { %1307 = vmatpush3.bf16.msra.mxu1 %v1504_v38 }
 0x178   :  { %1308 = vmatprep.subr.bf16.mxu1 %v1511_v12 }
 0x17b   :  { %1309 = vmatpush3.bf16.msra.mxu1 %v1505_v39 }
 0x17c   :  { %1310 = vmatprep.subr.bf16.mxu1 %v1511_v12 }
 0x17f   :  { %1311 = vmatpush3.bf16.msra.mxu1 %v1506_v40 }
 0x180   :  { %1312 = vmatprep.subr.bf16.mxu1 %v1511_v12 }
 0x183   :  { %1313 = vmatpush3.bf16.msra.mxu1 %v1507_v41 }
 0x184   :  { %1314 = vmatprep.subr.bf16.mxu1 %v1511_v12 }
 0x187   :  { %1315 = vmatpush3.bf16.msra.mxu1 %v1508_v21 }
 0x23d   :  { %v1285_v42 = vpop.f32.mrb[4].mxu1 }
 0x23e   :  { %v1286_v44 = vpop.f32.mrb[5].mxu1 }
 0x23f   :  { %v1287_v45 = vadd.f32 %v1286_v44, %v1285_v42  ;;  %v1288_v46 = vpop.f32.mrb[6].mxu1 }
 0x240   :  { %v1289_v47 = vpop.f32.mrb[7].mxu1 }
 0x241   :  { %v1020_v48 = vadd.f32 %v1287_v45, %v1243_v43 }
 0x243   :  { %v1025_v49 = vmax.f32 %v1020_v48, 0.0 }
 0x245   :  { %v1026_v50 = vpack.c.bf16 %v1025_v49, %v1025_v49 }
 0x247   :  { %1317 = vmatmul.mubr.bf16.vlgmr.msra.gmra.mrb[8].mxu1 %v1026_v50 }
 0x31a   :  { %v1132_v52 = vpop.f32.mrb[8].mxu1 }
 0x31b   :  { %v1133_v53 = vadd.f32 %v1260_v51, %v1132_v52  ;;  %v1318_v54 = vpop.f32.mrb[9].mxu1 }
 0x31c   :  { %v1135_v55 = vpop.f32.mrb[10].mxu1 }
 0x31d   :  { %v1138_v56 = vpack.c.bf16 %v1133_v53, %v1133_v53  ;;  %v1319_v57 = vpop.f32.mrb[11].mxu1 }
 0x31f   :  { %1139 = vst [vmem:[%s1977_s7] sm:$0x1] %v1138_v56 }

</bundles_post_ra>
